<compile_context>
chip_gen: v5e
topology: v5e:2x2
jax: 0.10.0
libtpu: 0.0.40
codegen_flags: <defaults>
</compile_context>

<pallas_src>
import jax
import jax.numpy as jnp
from jax.experimental import pallas as pl
from jax.experimental.pallas import tpu as pltpu


# ----------------------------------------------------------------------------
# Fused kernel
# ----------------------------------------------------------------------------
def _fused_gnn_kernel(x_ref, ei_ref, batch_ref,
                      w1_ref, w2_ref, w3_ref, ws_ref, vp_ref, o_ref):
    n_nodes = x_ref.shape[0]
    n_edges = ei_ref.shape[1]
    num_graphs = o_ref.shape[0]
    h1 = w1_ref.shape[2]
    h2 = w2_ref.shape[2]
    h3 = w3_ref.shape[2]
    k_values = (w1_ref.shape[0] - 1, w2_ref.shape[0] - 1, w3_ref.shape[0] - 1)
    k_max = max(k_values)

    # ---- A_norm built in-kernel (no wrapper launches / HBM round trip) -----
    ei = ei_ref[...]                                   # (2, E) int32
    src_row = ei[0:1, :]                               # (1, E)
    dst_row = ei[1:2, :]                               # (1, E)
    node_iota = jax.lax.broadcasted_iota(jnp.int32, (n_nodes, n_edges), 0)
    # bf16 one-hots: exact for 0/1 counts, half the vreg traffic, 2x MXU rate.
    s_oh = jnp.where(src_row == node_iota, 1.0, 0.0).astype(jnp.bfloat16)  # (N,E)
    d_oh = jnp.where(dst_row == node_iota, 1.0, 0.0).astype(jnp.bfloat16)  # (N,E)
    # a[i, j] = #edges (src=j -> dst=i)  ==  D @ S^T on the MXU, f32 accumulate
    a = jax.lax.dot_general(d_oh, s_oh, (((1,), (1,)), ((), ())),
                            preferred_element_type=jnp.float32)            # (N,N)
    # gcn_norm, add_self_loops=False (TAGConv): deg = in-degree, 0-deg -> 0.
    deg = jnp.sum(a, axis=1, keepdims=True)                                 # (N,1)
    dinv = jnp.where(deg > 0.0, jax.lax.rsqrt(deg), 0.0)                    # (N,1)
    rows = jax.lax.broadcasted_iota(jnp.int32, (n_nodes, n_nodes), 0)
    cols = jax.lax.broadcasted_iota(jnp.int32, (n_nodes, n_nodes), 1)
    dinv_diag = jnp.where(rows == cols, dinv, 0.0)                          # diag(dinv)
    # A_norm = diag(dinv) @ A @ diag(dinv); right diag via matmul -> no transpose
    a_norm = dinv * jnp.dot(a, dinv_diag, preferred_element_type=jnp.float32)

    # ---- shared adjacency powers: layer hops become independent matmuls ----
    a_pows = [a_norm]
    for _ in range(1, k_max):
        a_pows.append(jnp.dot(a_pows[-1], a_norm,
                              preferred_element_type=jnp.float32))

    # ---- packed vector params: [b1; b2; b3; b_short; w_lin; b_lin] ---------
    vp = vp_ref[...]                                   # (6, Hmax)
    b1 = vp[0:1, :h1]
    b2 = vp[1:2, :h2]
    b3 = vp[2:3, :h3]
    bs = vp[3:4, :h3]
    wl = vp[4:5, :h3]
    bl = vp[5:6, 0:1]

    x0 = x_ref[...]                                    # (N, Cin), kept for shortcut

    def tag_layer(h, w_ref, bias, k):
        # y = b + sum_k (A^k h) W_k   — accumulate form, no lane-offset concat.
        y = jnp.dot(h, w_ref[0], preferred_element_type=jnp.float32) + bias
        for kk in range(1, k + 1):
            hop = jnp.dot(a_pows[kk - 1], h, preferred_element_type=jnp.float32)
            y = y + jnp.dot(hop, w_ref[kk], preferred_element_type=jnp.float32)
        return jnp.maximum(y, 0.01 * y)                # LeakyReLU(0.01)

    h = tag_layer(x0, w1_ref, b1, k_values[0])         # dropout = identity (eval)
    h = tag_layer(h, w2_ref, b2, k_values[1])
    h = tag_layer(h, w3_ref, b3, k_values[2])

    # residual shortcut
    h = h + jnp.dot(x0, ws_ref[...], preferred_element_type=jnp.float32) + bs

    # ---- global max pool: additive mask, static per-graph loop -------------
    big = jnp.float32(1e30)
    bvec = batch_ref[...]                              # (N, 1) int32
    pooled_rows = []
    for g in range(num_graphs):
        mg = (bvec == g).astype(jnp.float32)           # (N, 1)
        pooled_rows.append(jnp.max(h + (mg - 1.0) * big, axis=0, keepdims=True))
    pooled = jnp.concatenate(pooled_rows, axis=0)      # (B, H3)

    # final Linear(H3 -> 1) as VPU multiply + lane-sum (no 1-lane MXU pass)
    o_ref[...] = jnp.sum(pooled * wl, axis=-1, keepdims=True) + bl


def fused_gnn(x, edge_index, batch_col, w1, w2, w3, w_short, vec_params,
              num_graphs):
    vmem = pl.BlockSpec(memory_space=pltpu.MemorySpace.VMEM)
    return pl.pallas_call(
        _fused_gnn_kernel,
        out_shape=jax.ShapeDtypeStruct((num_graphs, 1), jnp.float32),
        in_specs=[vmem] * 8,
        out_specs=vmem,
        compiler_params=pltpu.CompilerParams(vmem_limit_bytes=32 * 1024 * 1024),
    )(x, edge_index, batch_col, w1, w2, w3, w_short, vec_params)


# ----------------------------------------------------------------------------
# Glue: BN folding, parameter packing, init
# ----------------------------------------------------------------------------
def fold_bn_into_conv(w, b, gamma, beta, mu, var, eps=1e-5):
    """Fold eval-mode BatchNorm1d into TAGConv weights/bias.

    w: (K+1, Cin, Cout) stays 3-D (statically sliced in-kernel); b: (Cout,)."""
    scale = gamma * jax.lax.rsqrt(var + eps)
    return w * scale[None, None, :], (b - mu) * scale + beta


def init_params(key, input_dim, h1, h2, h3, k_values):
    ks = jax.random.split(key, 16)

    def unif(k, shape, fan_in):
        bound = 1.0 / jnp.sqrt(jnp.float32(fan_in))
        return jax.random.uniform(k, shape, jnp.float32, -bound, bound)

    dims = [(input_dim, h1), (h1, h2), (h2, h3)]
    params = {}
    for i, ((cin, cout), k) in enumerate(zip(dims, k_values)):
        params[f"conv{i+1}_w"] = unif(ks[2 * i], (k + 1, cin, cout), (k + 1) * cin)
        params[f"conv{i+1}_b"] = unif(ks[2 * i + 1], (cout,), (k + 1) * cin)
        params[f"bn{i+1}_gamma"] = jnp.ones((cout,), jnp.float32)
        params[f"bn{i+1}_beta"] = jnp.zeros((cout,), jnp.float32)
        params[f"bn{i+1}_mean"] = jnp.zeros((cout,), jnp.float32)
        params[f"bn{i+1}_var"] = jnp.ones((cout,), jnp.float32)
    params["short_w"] = unif(ks[6], (input_dim, h3), input_dim)
    params["short_b"] = unif(ks[7], (h3,), input_dim)
    params["lin1_w"] = unif(ks[8], (h3, 1), h3)
    params["lin1_b"] = unif(ks[9], (1,), h3)
    return params


def simple_gnn_forward(params, x, edge_attr, batch, num_graphs):
    # edge_index = edge_attr.reshape(2, -1)  (mirrors the reference forward)
    edge_index = jnp.reshape(edge_attr, (2, -1)).astype(jnp.int32)
    n = x.shape[0]

    # Fold BatchNorm (eval) into conv weights/biases at trace time.
    folded = [fold_bn_into_conv(
        params[f"conv{i+1}_w"], params[f"conv{i+1}_b"],
        params[f"bn{i+1}_gamma"], params[f"bn{i+1}_beta"],
        params[f"bn{i+1}_mean"], params[f"bn{i+1}_var"]) for i in range(3)]
    (w1, b1), (w2, b2), (w3, b3) = folded

    # Pack the small vector params into one slab (done once per param set in
    # practice; cuts 6 tiny DMAs down to 1 on this latency-bound kernel).
    h1, h2, h3 = w1.shape[2], w2.shape[2], w3.shape[2]
    h_max = max(h1, h2, h3)

    def pad_row(v):
        return jnp.pad(v, (0, h_max - v.shape[0])).reshape(1, h_max)

    vec_params = jnp.concatenate([
        pad_row(b1), pad_row(b2), pad_row(b3),
        pad_row(params["short_b"]),
        pad_row(params["lin1_w"].reshape(-1)),
        pad_row(params["lin1_b"].reshape(-1)),
    ], axis=0)                                          # (6, Hmax)

    batch_col = batch.astype(jnp.int32).reshape(n, 1)

    return fused_gnn(x, edge_index, batch_col, w1, w2, w3,
                     params["short_w"], vec_params, num_graphs)


if __name__ == "__main__":
    # small config
    N, B = 32, 2                 # 32 nodes, 2 graphs (16 nodes each)
    E = 64                       # edges
    input_dim, h1, h2, h3 = 16, 32, 32, 32
    k_values = (2, 2, 2)

    key = jax.random.PRNGKey(0)
    kx, ke, kp = jax.random.split(key, 3)

    x = jax.random.normal(kx, (N, input_dim), jnp.float32)
    # edge_attr holds node indices and is reshaped to (2, E) in forward,
    # exactly mirroring the reference module's usage.
    edge_attr = jax.random.randint(ke, (E, 2), 0, N, jnp.int32)
    batch = jnp.concatenate([jnp.zeros((N // 2,), jnp.int32),
                             jnp.ones((N // 2,), jnp.int32)])

    params = init_params(kp, input_dim, h1, h2, h3, k_values)

    out = simple_gnn_forward(params, x, edge_attr, batch, B)
    out = jax.block_until_ready(out)
    assert out.shape == (B, 1) and out.dtype == jnp.float32
    print("KERNEL_OK")
</pallas_src>

<mosaic_0001>
module attributes {stable_mosaic.version = 11 : i64} {
  func.func @_fused_gnn_kernel(%arg0: memref<32x16xf32, #tpu.memory_space<vmem>>, %arg1: memref<2x64xi32, #tpu.memory_space<vmem>>, %arg2: memref<32x1xi32, #tpu.memory_space<vmem>>, %arg3: memref<3x16x32xf32, #tpu.memory_space<vmem>>, %arg4: memref<3x32x32xf32, #tpu.memory_space<vmem>>, %arg5: memref<3x32x32xf32, #tpu.memory_space<vmem>>, %arg6: memref<16x32xf32, #tpu.memory_space<vmem>>, %arg7: memref<6x32xf32, #tpu.memory_space<vmem>>, %arg8: memref<2x1xf32, #tpu.memory_space<vmem>>) attributes {dimension_semantics = [], scalar_prefetch = 0 : i64, scratch_operands = 0 : i64, tpu.core_type = #tpu.core_type<tc>} {
    %c0 = arith.constant 0 : index
    %c0_0 = arith.constant 0 : index
    %0 = vector.load %arg1[%c0, %c0_0] : memref<2x64xi32, #tpu.memory_space<vmem>>, vector<2x64xi32>
    %1 = vector.extract_strided_slice %0 {offsets = [0, 0], sizes = [1, 64], strides = [1, 1]} : vector<2x64xi32> to vector<1x64xi32>
    %2 = vector.extract_strided_slice %0 {offsets = [1, 0], sizes = [1, 64], strides = [1, 1]} : vector<2x64xi32> to vector<1x64xi32>
    %3 = tpu.iota {dimensions = array<i32: 0>} : vector<32x64xi32>
    %4 = vector.broadcast %1 : vector<1x64xi32> to vector<32x64xi32>
    %5 = arith.cmpi eq, %4, %3 : vector<32x64xi32>
    %cst = arith.constant 1.000000e+00 : f32
    %cst_1 = arith.constant 0.000000e+00 : f32
    %6 = vector.broadcast %cst : f32 to vector<32x64xf32>
    %7 = vector.broadcast %cst_1 : f32 to vector<32x64xf32>
    %8 = arith.select %5, %6, %7 : vector<32x64xi1>, vector<32x64xf32>
    %9 = arith.truncf %8 : vector<32x64xf32> to vector<32x64xbf16>
    %10 = vector.broadcast %2 : vector<1x64xi32> to vector<32x64xi32>
    %11 = arith.cmpi eq, %10, %3 : vector<32x64xi32>
    %cst_2 = arith.constant 1.000000e+00 : f32
    %cst_3 = arith.constant 0.000000e+00 : f32
    %12 = vector.broadcast %cst_2 : f32 to vector<32x64xf32>
    %13 = vector.broadcast %cst_3 : f32 to vector<32x64xf32>
    %14 = arith.select %11, %12, %13 : vector<32x64xi1>, vector<32x64xf32>
    %15 = arith.truncf %14 : vector<32x64xf32> to vector<32x64xbf16>
    %cst_4 = arith.constant dense<0.000000e+00> : vector<32x32xf32>
    %16 = tpu.matmul %15, %9, %cst_4 {dimension_numbers = #tpu.dot_dimension_numbers<[1], [1], [0], [0], [0, 0, 1, 0], [], []>} : vector<32x64xbf16>, vector<32x64xbf16>, vector<32x32xf32> -> vector<32x32xf32>
    %cst_5 = arith.constant dense<0.000000e+00> : vector<32xf32>
    %17 = vector.multi_reduction <add>, %16, %cst_5 [1] : vector<32x32xf32> to vector<32xf32>
    %18 = vector.shape_cast %17 : vector<32xf32> to vector<32x1xf32>
    %cst_6 = arith.constant 0.000000e+00 : f32
    %19 = vector.broadcast %cst_6 : f32 to vector<32x1xf32>
    %20 = arith.cmpf ogt, %18, %19 : vector<32x1xf32>
    %21 = math.rsqrt %18 : vector<32x1xf32>
    %cst_7 = arith.constant 0.000000e+00 : f32
    %22 = vector.broadcast %cst_7 : f32 to vector<32x1xf32>
    %23 = arith.select %20, %21, %22 : vector<32x1xi1>, vector<32x1xf32>
    %24 = tpu.iota {dimensions = array<i32: 0>} : vector<32x32xi32>
    %25 = tpu.iota {dimensions = array<i32: 1>} : vector<32x32xi32>
    %26 = arith.cmpi eq, %24, %25 : vector<32x32xi32>
    %cst_8 = arith.constant 0.000000e+00 : f32
    %27 = vector.shape_cast %23 : vector<32x1xf32> to vector<32x1xf32>
    %28 = vector.broadcast %27 : vector<32x1xf32> to vector<32x32xf32>
    %29 = vector.broadcast %cst_8 : f32 to vector<32x32xf32>
    %30 = arith.select %26, %28, %29 : vector<32x32xi1>, vector<32x32xf32>
    %cst_9 = arith.constant dense<0.000000e+00> : vector<32x32xf32>
    %31 = tpu.matmul %16, %30, %cst_9 {dimension_numbers = #tpu.dot_dimension_numbers<[1], [0], [0], [1], [0, 0, 1, 1], [], []>} : vector<32x32xf32>, vector<32x32xf32>, vector<32x32xf32> -> vector<32x32xf32>
    %32 = vector.broadcast %23 : vector<32x1xf32> to vector<32x32xf32>
    %33 = arith.mulf %32, %31 : vector<32x32xf32>
    %cst_10 = arith.constant dense<0.000000e+00> : vector<32x32xf32>
    %34 = tpu.matmul %33, %33, %cst_10 {dimension_numbers = #tpu.dot_dimension_numbers<[1], [0], [0], [1], [0, 0, 1, 1], [], []>} : vector<32x32xf32>, vector<32x32xf32>, vector<32x32xf32> -> vector<32x32xf32>
    %c0_11 = arith.constant 0 : index
    %c0_12 = arith.constant 0 : index
    %35 = vector.load %arg7[%c0_11, %c0_12] : memref<6x32xf32, #tpu.memory_space<vmem>>, vector<6x32xf32>
    %36 = vector.extract_strided_slice %35 {offsets = [0, 0], sizes = [1, 32], strides = [1, 1]} : vector<6x32xf32> to vector<1x32xf32>
    %37 = vector.extract_strided_slice %35 {offsets = [1, 0], sizes = [1, 32], strides = [1, 1]} : vector<6x32xf32> to vector<1x32xf32>
    %38 = vector.extract_strided_slice %35 {offsets = [2, 0], sizes = [1, 32], strides = [1, 1]} : vector<6x32xf32> to vector<1x32xf32>
    %39 = vector.extract_strided_slice %35 {offsets = [3, 0], sizes = [1, 32], strides = [1, 1]} : vector<6x32xf32> to vector<1x32xf32>
    %40 = vector.extract_strided_slice %35 {offsets = [4, 0], sizes = [1, 32], strides = [1, 1]} : vector<6x32xf32> to vector<1x32xf32>
    %41 = vector.extract_strided_slice %35 {offsets = [5, 0], sizes = [1, 1], strides = [1, 1]} : vector<6x32xf32> to vector<1x1xf32>
    %c0_13 = arith.constant 0 : index
    %c0_14 = arith.constant 0 : index
    %42 = vector.load %arg0[%c0_13, %c0_14] : memref<32x16xf32, #tpu.memory_space<vmem>>, vector<32x16xf32>
    %c0_15 = arith.constant 0 : index
    %c0_16 = arith.constant 0 : index
    %c0_17 = arith.constant 0 : index
    %43 = vector.load %arg3[%c0_15, %c0_16, %c0_17] : memref<3x16x32xf32, #tpu.memory_space<vmem>>, vector<1x16x32xf32>
    %44 = vector.shape_cast %43 : vector<1x16x32xf32> to vector<16x32xf32>
    %cst_18 = arith.constant dense<0.000000e+00> : vector<32x32xf32>
    %45 = tpu.matmul %42, %44, %cst_18 {dimension_numbers = #tpu.dot_dimension_numbers<[1], [0], [0], [1], [0, 0, 1, 1], [], []>} : vector<32x16xf32>, vector<16x32xf32>, vector<32x32xf32> -> vector<32x32xf32>
    %46 = vector.broadcast %36 : vector<1x32xf32> to vector<32x32xf32>
    %47 = arith.addf %45, %46 : vector<32x32xf32>
    %cst_19 = arith.constant dense<0.000000e+00> : vector<32x16xf32>
    %48 = tpu.matmul %33, %42, %cst_19 {dimension_numbers = #tpu.dot_dimension_numbers<[1], [0], [0], [1], [0, 0, 1, 1], [], []>} : vector<32x32xf32>, vector<32x16xf32>, vector<32x16xf32> -> vector<32x16xf32>
    %c1 = arith.constant 1 : index
    %c0_20 = arith.constant 0 : index
    %c0_21 = arith.constant 0 : index
    %49 = vector.load %arg3[%c1, %c0_20, %c0_21] : memref<3x16x32xf32, #tpu.memory_space<vmem>>, vector<1x16x32xf32>
    %50 = vector.shape_cast %49 : vector<1x16x32xf32> to vector<16x32xf32>
    %cst_22 = arith.constant dense<0.000000e+00> : vector<32x32xf32>
    %51 = tpu.matmul %48, %50, %cst_22 {dimension_numbers = #tpu.dot_dimension_numbers<[1], [0], [0], [1], [0, 0, 1, 1], [], []>} : vector<32x16xf32>, vector<16x32xf32>, vector<32x32xf32> -> vector<32x32xf32>
    %52 = arith.addf %47, %51 : vector<32x32xf32>
    %cst_23 = arith.constant dense<0.000000e+00> : vector<32x16xf32>
    %53 = tpu.matmul %34, %42, %cst_23 {dimension_numbers = #tpu.dot_dimension_numbers<[1], [0], [0], [1], [0, 0, 1, 1], [], []>} : vector<32x32xf32>, vector<32x16xf32>, vector<32x16xf32> -> vector<32x16xf32>
    %c2 = arith.constant 2 : index
    %c0_24 = arith.constant 0 : index
    %c0_25 = arith.constant 0 : index
    %54 = vector.load %arg3[%c2, %c0_24, %c0_25] : memref<3x16x32xf32, #tpu.memory_space<vmem>>, vector<1x16x32xf32>
    %55 = vector.shape_cast %54 : vector<1x16x32xf32> to vector<16x32xf32>
    %cst_26 = arith.constant dense<0.000000e+00> : vector<32x32xf32>
    %56 = tpu.matmul %53, %55, %cst_26 {dimension_numbers = #tpu.dot_dimension_numbers<[1], [0], [0], [1], [0, 0, 1, 1], [], []>} : vector<32x16xf32>, vector<16x32xf32>, vector<32x32xf32> -> vector<32x32xf32>
    %57 = arith.addf %52, %56 : vector<32x32xf32>
    %cst_27 = arith.constant 0.00999999977 : f32
    %58 = vector.broadcast %cst_27 : f32 to vector<32x32xf32>
    %59 = arith.mulf %58, %57 : vector<32x32xf32>
    %60 = arith.maximumf %57, %59 : vector<32x32xf32>
    %c0_28 = arith.constant 0 : index
    %c0_29 = arith.constant 0 : index
    %c0_30 = arith.constant 0 : index
    %61 = vector.load %arg4[%c0_28, %c0_29, %c0_30] : memref<3x32x32xf32, #tpu.memory_space<vmem>>, vector<1x32x32xf32>
    %62 = vector.shape_cast %61 : vector<1x32x32xf32> to vector<32x32xf32>
    %cst_31 = arith.constant dense<0.000000e+00> : vector<32x32xf32>
    %63 = tpu.matmul %60, %62, %cst_31 {dimension_numbers = #tpu.dot_dimension_numbers<[1], [0], [0], [1], [0, 0, 1, 1], [], []>} : vector<32x32xf32>, vector<32x32xf32>, vector<32x32xf32> -> vector<32x32xf32>
    %64 = vector.broadcast %37 : vector<1x32xf32> to vector<32x32xf32>
    %65 = arith.addf %63, %64 : vector<32x32xf32>
    %cst_32 = arith.constant dense<0.000000e+00> : vector<32x32xf32>
    %66 = tpu.matmul %33, %60, %cst_32 {dimension_numbers = #tpu.dot_dimension_numbers<[1], [0], [0], [1], [0, 0, 1, 1], [], []>} : vector<32x32xf32>, vector<32x32xf32>, vector<32x32xf32> -> vector<32x32xf32>
    %c1_33 = arith.constant 1 : index
    %c0_34 = arith.constant 0 : index
    %c0_35 = arith.constant 0 : index
    %67 = vector.load %arg4[%c1_33, %c0_34, %c0_35] : memref<3x32x32xf32, #tpu.memory_space<vmem>>, vector<1x32x32xf32>
    %68 = vector.shape_cast %67 : vector<1x32x32xf32> to vector<32x32xf32>
    %cst_36 = arith.constant dense<0.000000e+00> : vector<32x32xf32>
    %69 = tpu.matmul %66, %68, %cst_36 {dimension_numbers = #tpu.dot_dimension_numbers<[1], [0], [0], [1], [0, 0, 1, 1], [], []>} : vector<32x32xf32>, vector<32x32xf32>, vector<32x32xf32> -> vector<32x32xf32>
    %70 = arith.addf %65, %69 : vector<32x32xf32>
    %cst_37 = arith.constant dense<0.000000e+00> : vector<32x32xf32>
    %71 = tpu.matmul %34, %60, %cst_37 {dimension_numbers = #tpu.dot_dimension_numbers<[1], [0], [0], [1], [0, 0, 1, 1], [], []>} : vector<32x32xf32>, vector<32x32xf32>, vector<32x32xf32> -> vector<32x32xf32>
    %c2_38 = arith.constant 2 : index
    %c0_39 = arith.constant 0 : index
    %c0_40 = arith.constant 0 : index
    %72 = vector.load %arg4[%c2_38, %c0_39, %c0_40] : memref<3x32x32xf32, #tpu.memory_space<vmem>>, vector<1x32x32xf32>
    %73 = vector.shape_cast %72 : vector<1x32x32xf32> to vector<32x32xf32>
    %cst_41 = arith.constant dense<0.000000e+00> : vector<32x32xf32>
    %74 = tpu.matmul %71, %73, %cst_41 {dimension_numbers = #tpu.dot_dimension_numbers<[1], [0], [0], [1], [0, 0, 1, 1], [], []>} : vector<32x32xf32>, vector<32x32xf32>, vector<32x32xf32> -> vector<32x32xf32>
    %75 = arith.addf %70, %74 : vector<32x32xf32>
    %cst_42 = arith.constant 0.00999999977 : f32
    %76 = vector.broadcast %cst_42 : f32 to vector<32x32xf32>
    %77 = arith.mulf %76, %75 : vector<32x32xf32>
    %78 = arith.maximumf %75, %77 : vector<32x32xf32>
    %c0_43 = arith.constant 0 : index
    %c0_44 = arith.constant 0 : index
    %c0_45 = arith.constant 0 : index
    %79 = vector.load %arg5[%c0_43, %c0_44, %c0_45] : memref<3x32x32xf32, #tpu.memory_space<vmem>>, vector<1x32x32xf32>
    %80 = vector.shape_cast %79 : vector<1x32x32xf32> to vector<32x32xf32>
    %cst_46 = arith.constant dense<0.000000e+00> : vector<32x32xf32>
    %81 = tpu.matmul %78, %80, %cst_46 {dimension_numbers = #tpu.dot_dimension_numbers<[1], [0], [0], [1], [0, 0, 1, 1], [], []>} : vector<32x32xf32>, vector<32x32xf32>, vector<32x32xf32> -> vector<32x32xf32>
    %82 = vector.broadcast %38 : vector<1x32xf32> to vector<32x32xf32>
    %83 = arith.addf %81, %82 : vector<32x32xf32>
    %cst_47 = arith.constant dense<0.000000e+00> : vector<32x32xf32>
    %84 = tpu.matmul %33, %78, %cst_47 {dimension_numbers = #tpu.dot_dimension_numbers<[1], [0], [0], [1], [0, 0, 1, 1], [], []>} : vector<32x32xf32>, vector<32x32xf32>, vector<32x32xf32> -> vector<32x32xf32>
    %c1_48 = arith.constant 1 : index
    %c0_49 = arith.constant 0 : index
    %c0_50 = arith.constant 0 : index
    %85 = vector.load %arg5[%c1_48, %c0_49, %c0_50] : memref<3x32x32xf32, #tpu.memory_space<vmem>>, vector<1x32x32xf32>
    %86 = vector.shape_cast %85 : vector<1x32x32xf32> to vector<32x32xf32>
    %cst_51 = arith.constant dense<0.000000e+00> : vector<32x32xf32>
    %87 = tpu.matmul %84, %86, %cst_51 {dimension_numbers = #tpu.dot_dimension_numbers<[1], [0], [0], [1], [0, 0, 1, 1], [], []>} : vector<32x32xf32>, vector<32x32xf32>, vector<32x32xf32> -> vector<32x32xf32>
    %88 = arith.addf %83, %87 : vector<32x32xf32>
    %cst_52 = arith.constant dense<0.000000e+00> : vector<32x32xf32>
    %89 = tpu.matmul %34, %78, %cst_52 {dimension_numbers = #tpu.dot_dimension_numbers<[1], [0], [0], [1], [0, 0, 1, 1], [], []>} : vector<32x32xf32>, vector<32x32xf32>, vector<32x32xf32> -> vector<32x32xf32>
    %c2_53 = arith.constant 2 : index
    %c0_54 = arith.constant 0 : index
    %c0_55 = arith.constant 0 : index
    %90 = vector.load %arg5[%c2_53, %c0_54, %c0_55] : memref<3x32x32xf32, #tpu.memory_space<vmem>>, vector<1x32x32xf32>
    %91 = vector.shape_cast %90 : vector<1x32x32xf32> to vector<32x32xf32>
    %cst_56 = arith.constant dense<0.000000e+00> : vector<32x32xf32>
    %92 = tpu.matmul %89, %91, %cst_56 {dimension_numbers = #tpu.dot_dimension_numbers<[1], [0], [0], [1], [0, 0, 1, 1], [], []>} : vector<32x32xf32>, vector<32x32xf32>, vector<32x32xf32> -> vector<32x32xf32>
    %93 = arith.addf %88, %92 : vector<32x32xf32>
    %cst_57 = arith.constant 0.00999999977 : f32
    %94 = vector.broadcast %cst_57 : f32 to vector<32x32xf32>
    %95 = arith.mulf %94, %93 : vector<32x32xf32>
    %96 = arith.maximumf %93, %95 : vector<32x32xf32>
    %c0_58 = arith.constant 0 : index
    %c0_59 = arith.constant 0 : index
    %97 = vector.load %arg6[%c0_58, %c0_59] : memref<16x32xf32, #tpu.memory_space<vmem>>, vector<16x32xf32>
    %cst_60 = arith.constant dense<0.000000e+00> : vector<32x32xf32>
    %98 = tpu.matmul %42, %97, %cst_60 {dimension_numbers = #tpu.dot_dimension_numbers<[1], [0], [0], [1], [0, 0, 1, 1], [], []>} : vector<32x16xf32>, vector<16x32xf32>, vector<32x32xf32> -> vector<32x32xf32>
    %99 = arith.addf %96, %98 : vector<32x32xf32>
    %100 = vector.broadcast %39 : vector<1x32xf32> to vector<32x32xf32>
    %101 = arith.addf %99, %100 : vector<32x32xf32>
    %c0_61 = arith.constant 0 : index
    %c0_62 = arith.constant 0 : index
    %102 = vector.load %arg2[%c0_61, %c0_62] : memref<32x1xi32, #tpu.memory_space<vmem>>, vector<32x1xi32>
    %c0_i32 = arith.constant 0 : i32
    %103 = vector.broadcast %c0_i32 : i32 to vector<32x1xi32>
    %104 = arith.cmpi eq, %102, %103 : vector<32x1xi32>
    %105 = arith.extui %104 : vector<32x1xi1> to vector<32x1xi32>
    %106 = arith.sitofp %105 : vector<32x1xi32> to vector<32x1xf32>
    %cst_63 = arith.constant 1.000000e+00 : f32
    %107 = vector.broadcast %cst_63 : f32 to vector<32x1xf32>
    %108 = arith.subf %106, %107 : vector<32x1xf32>
    %cst_64 = arith.constant 1.000000e+30 : f32
    %109 = vector.broadcast %cst_64 : f32 to vector<32x1xf32>
    %110 = arith.mulf %108, %109 : vector<32x1xf32>
    %111 = vector.broadcast %110 : vector<32x1xf32> to vector<32x32xf32>
    %112 = arith.addf %101, %111 : vector<32x32xf32>
    %cst_65 = arith.constant dense<0xFF800000> : vector<32xf32>
    %113 = vector.multi_reduction <maximumf>, %112, %cst_65 [0] : vector<32x32xf32> to vector<32xf32>
    %114 = vector.shape_cast %113 : vector<32xf32> to vector<1x32xf32>
    %c1_i32 = arith.constant 1 : i32
    %115 = vector.broadcast %c1_i32 : i32 to vector<32x1xi32>
    %116 = arith.cmpi eq, %102, %115 : vector<32x1xi32>
    %117 = arith.extui %116 : vector<32x1xi1> to vector<32x1xi32>
    %118 = arith.sitofp %117 : vector<32x1xi32> to vector<32x1xf32>
    %cst_66 = arith.constant 1.000000e+00 : f32
    %119 = vector.broadcast %cst_66 : f32 to vector<32x1xf32>
    %120 = arith.subf %118, %119 : vector<32x1xf32>
    %cst_67 = arith.constant 1.000000e+30 : f32
    %121 = vector.broadcast %cst_67 : f32 to vector<32x1xf32>
    %122 = arith.mulf %120, %121 : vector<32x1xf32>
    %123 = vector.broadcast %122 : vector<32x1xf32> to vector<32x32xf32>
    %124 = arith.addf %101, %123 : vector<32x32xf32>
    %cst_68 = arith.constant dense<0xFF800000> : vector<32xf32>
    %125 = vector.multi_reduction <maximumf>, %124, %cst_68 [0] : vector<32x32xf32> to vector<32xf32>
    %126 = vector.shape_cast %125 : vector<32xf32> to vector<1x32xf32>
    %127 = tpu.concatenate %114, %126 in 0 : vector<1x32xf32>, vector<1x32xf32> -> vector<2x32xf32>
    %128 = vector.broadcast %40 : vector<1x32xf32> to vector<2x32xf32>
    %129 = arith.mulf %127, %128 : vector<2x32xf32>
    %cst_69 = arith.constant dense<0.000000e+00> : vector<2xf32>
    %130 = vector.multi_reduction <add>, %129, %cst_69 [1] : vector<2x32xf32> to vector<2xf32>
    %131 = vector.shape_cast %130 : vector<2xf32> to vector<2x1xf32>
    %132 = vector.broadcast %41 : vector<1x1xf32> to vector<2x1xf32>
    %133 = arith.addf %131, %132 : vector<2x1xf32>
    %c0_70 = arith.constant 0 : index
    %c0_71 = arith.constant 0 : index
    %134 = vector.load %arg8[%c0_70, %c0_71] : memref<2x1xf32, #tpu.memory_space<vmem>>, vector<2x1xf32>
    tpu.vector_store %arg8[%c0_70, %c0_71], %133 {strides = array<i32>} : memref<2x1xf32, #tpu.memory_space<vmem>>, vector<2x1xf32>,
    return
  }
}

</mosaic_0001>

<bundles_post_ra>
// kernel: tpu_custom_call.1
= control target key start
LH: loop header
LB: loop body
LE: loop exit
PB: predicated region body
PF: predicated region fallthrough
CT: control target
= control target key end

     0   :  { %13 = vsyncpa [#allocation3], 0  ;;  %s1638_s0 = inlined_call_operand.vmem [shape: f32[32,16], index: 0, kind: input, shape index: {}]   ;;  %s1639_s1 = inlined_call_operand.vmem [shape: s32[2,64], index: 1, kind: input, shape index: {}]   ;;  %s1640_s2 = inlined_call_operand.vmem [shape: s32[32,1], index: 2, kind: input, shape index: {}]   ;;  %s1641_s3 = inlined_call_operand.vmem [shape: f32[3,16,32], index: 3, kind: input, shape index: {}]   ;;  %s1642_s4 = inlined_call_operand.hbm [shape: f32[3,32,32], index: 4, kind: input, shape index: {}]   ;;  %s1643_s5 = inlined_call_operand.hbm [shape: f32[3,32,32], index: 5, kind: input, shape index: {}]   ;;  %s1644_s6 = inlined_call_operand.vmem [shape: f32[16,32], index: 6, kind: input, shape index: {}]   ;;  %s1645_s7 = inlined_call_operand.vmem [shape: f32[6,32], index: 7, kind: input, shape index: {}]   ;;  %s1646_s8 = inlined_call_operand.vmem [shape: f32[2,1], index: 8, kind: output, shape index: {}]  }
   0x1   :  { %s27_s29 = sshll.u32 %s1642_s4, 4  ;;  %s28_s29 = int_to_ptr.hbm [resolvable:$true] %s27_s29 }
   0x2   :  { %14 = vsyncpa [#allocation5], 0  ;;  %s1270_s30 = smov [#allocation2]   ;;  %s40_s12 = sshll.u32 %s1643_s5, 4  ;;  %s41_s12 = int_to_ptr.hbm [resolvable:$true] %s40_s12 }
   0x3   :  { %s29_s9 = sshll.u32 %s1270_s30, 4  ;;  %s1271_s13 = smov 128   ;;  %s30_s9 = int_to_ptr.vmem [resolvable:$true] %s29_s9 }
   0x4   :  { %s1272_s14 = smov 8   ;;  %s1273_s15 = smov [#allocation4]  }
   0x5   :  { %35 = dma.hbm_to_vmem [thread:$0]  %s28_s29, 1536, %s30_s9, [#allocation3], %s1271_s13, %s1271_s13, %s1272_s14  }
   0x6   :  { %s42_s16 = sshll.u32 %s1273_s15, 4  ;;  %s43_s16 = int_to_ptr.vmem [resolvable:$true] %s42_s16 }
   0x7   :  { %48 = dma.hbm_to_vmem [thread:$0]  %s41_s12, 1536, %s43_s16, [#allocation5], %s1271_s13, %s1271_s13, %s1272_s14  }
   0x8   :  { %1266 = dma.done.wait [#allocation3], 1536  }
   0x9   :  { %1267 = vsyncadd [#allocation3], 4294965760 }
   0xa   :  { %1268 = dma.done.wait [#allocation5], 1536  }
   0xb   :  { %1269 = vsyncadd [#allocation5], 4294965760  ;;  %v63_v0 = vlaneseq  ;;  %v62_v5 = vld [vmem:[%s1639_s1] sm:$0x3]  ;;  %v1274_v7 = vmov 0.0   ;;  %vm90_vm4 = vcmask 523264  }
   0xc   :  { %v68_v6 = vperm.slane %v62_v5, 0  ;;  %v79_v14 = vperm.slane %v62_v5, 1  ;;  %vm122_vm9 = vcmask 261120   ;;  %v285_v63 = vld [vmem:[%s1641_s3 + $0x8] sm:$0xff] }
   0xd   :  { %v1328_v1 = vshrl.u32 %v63_v0, 7  ;;  %v184_v45 = vand.u32 127, %v63_v0  ;;  %v284_v0 = vld [vmem:[%s1641_s3] sm:$0xff]  ;;  %314 = vmatpush.msra.mxu3 %v285_v63 }
   0xf   :  { %v1331_v2 = vadd.s32 16, %v1328_v1  ;;  %v1334_v3 = vadd.s32 24, %v1328_v1  ;;  %v1337_v4 = vadd.s32 8, %v1328_v1  ;;  %vm69_vm2 = vcmp.eq.s32.totalorder %v68_v6, %v1328_v1  ;;  %315 = vmatpush.msra.mxu3 %v284_v0 }
  0x10   :  { %v73_v11 = vsel %vm69_vm2, 1.0, %v1274_v7  ;;  %vm80_vm5 = vcmp.eq.s32.totalorder %v79_v14, %v1328_v1 }
  0x11   :  { %vm71_vm0 = vcmp.eq.s32.totalorder %v68_v6, %v1331_v2  ;;  %vm72_vm1 = vcmp.eq.s32.totalorder %v68_v6, %v1334_v3  ;;  %vm70_vm3 = vcmp.eq.s32.totalorder %v68_v6, %v1337_v4  ;;  %vm81_vm6 = vcmp.eq.s32.totalorder %v79_v14, %v1337_v4  ;;  %v1415_v6 = vld [vmem:[%s1638_s0] sm:$0xff] }
  0x12   :  { %v75_v8 = vsel %vm71_vm0, 1.0, %v1274_v7  ;;  %v76_v9 = vsel %vm72_vm1, 1.0, %v1274_v7  ;;  %v74_v12 = vsel %vm70_vm3, 1.0, %v1274_v7  ;;  %v84_v17 = vsel %vm80_vm5, 1.0, %v1274_v7 }
  0x13   :  { %v78_v10 = vpack.c.bf16 %v76_v9, %v75_v8  ;;  %v77_v15 = vpack.c.bf16 %v74_v12, %v73_v11  ;;  %v85_v18 = vsel %vm81_vm6, 1.0, %v1274_v7  ;;  %vm82_vm7 = vcmp.eq.s32.totalorder %v79_v14, %v1331_v2  ;;  %v1421_v8 = vld [vmem:[%s1638_s0 + $0x18] sm:$0xff]  ;;  %v1433_v11 = vld [vmem:[%s1638_s0 + $0x10] sm:$0xff] }
  0x14   :  { %v88_v19 = vpack.c.bf16 %v85_v18, %v84_v17  ;;  %vm83_vm8 = vcmp.eq.s32.totalorder %v79_v14, %v1334_v3  ;;  %v86_v20 = vsel %vm82_vm7, 1.0, %v1274_v7  ;;  %vm188_vm13 = vcmp.eq.s32.totalorder %v1334_v3, %v184_v45  ;;  %341 = vmatpush.msrb.mxu3 %v1421_v8 }
  0x15   :  { %v101_v13 = vsel %vm90_vm4, %v78_v10, 0  ;;  %v98_v16 = vsel %vm90_vm4, %v77_v15, 0  ;;  %v87_v21 = vsel %vm83_vm8, 1.0, %v1274_v7  ;;  %vm187_vm7 = vcmp.eq.s32.totalorder %v1331_v2, %v184_v45 }
  0x16   :  { %109 = vmatpush.bf16.xpose.msra.mxu0 %v101_v13  ;;  %v89_v22 = vpack.c.bf16 %v87_v21, %v86_v20  ;;  %342 = vmatpush.msrb.mxu3 %v1433_v11  ;;  %v1126_v20 = vld [vmem:[%s1641_s3 + $0x18] sm:$0xff] }
  0x1e   :  { %110 = vmatpush.bf16.xpose.msra.mxu0 %v98_v16 }
  0x25   :  { %1103 = vmatmul.msk.bf16.vlgmr.msra.gmra.mxu0 %vm90_vm4, %v88_v19 }
  0x35   :  { %1104 = vmatmul.msk.bf16.gmra.mxu0 %vm90_vm4, %v89_v22  ;;  %v1125_v22 = vld [vmem:[%s1641_s3 + $0x10] sm:$0xff] }
  0xa2   :  { %v1362_v23 = vpop.f32.mrf.mxu0 }
  0xa3   :  { %v123_v27 = vsel %vm122_vm9, %v1362_v23, 0.0 }
  0xaa   :  { %v1364_v24 = vpop.f32.mrf.mxu0 }
  0xab   :  { %v126_v25 = vsel %vm122_vm9, %v1364_v24, 0.0 }
  0xac   :  { %127 = vadd.xlane.f32.xlu1 %v126_v25 }
  0xb2   :  { %v1368_v26 = vpop.f32.mrf.mxu0 }
  0xb3   :  { %v129_v30 = vsel %vm122_vm9, %v1368_v26, 0.0 }
  0xb4   :  { %124 = vadd.xlane.f32.xlu1 %v123_v27 }
  0xba   :  { %v1372_v28 = vpop.f32.mrf.mxu0 }
  0xbb   :  { %v132_v29 = vsel %vm122_vm9, %v1372_v28, 0.0 }
  0xbc   :  { %133 = vadd.xlane.f32.xlu0 %v132_v29 }
  0xc4   :  { %130 = vadd.xlane.f32.xlu0 %v129_v30 }
 0x11f   :  { %v1378_v31 = vpop.xlane.xlu1 %127 }
 0x120   :  { %1210 = vrsqrt.f32 %v1378_v31  ;;  %vm155_vm1 = vweird.f32 %v1378_v31 }
 0x126   :  { %v1211_v34 = vpop.eup %1210 }
 0x127   :  { %v1380_v32 = vpop.xlane.xlu1 %124  ;;  %v150_v36 = vmul.f32 %v1211_v34, %v1378_v31  ;;  %vm156_vm15 = vweird.f32 %v1211_v34 }
 0x128   :  { %1212 = vrsqrt.f32 %v1380_v32  ;;  %vm1396_vm3 = vmor %vm155_vm1, %vm156_vm15  ;;  %vm145_vm5 = vweird.f32 %v1380_v32  ;;  %vm135_vm15 = vcmp.gt.f32.partialorder %v1380_v32, 0.0 }
 0x129   :  { %v151_v41 = vmul.f32 %v1211_v34, %v150_v36 }
 0x12b   :  { %v152_v46 = vmul.f32 0.5, %v151_v41  ;;  %v505_v41 = vld [vmem:[#allocation2 + $0x10] sm:$0xff] }
 0x12d   :  { %v153_v52 = vsub.f32 1.5, %v152_v46 }
 0x12e   :  { %v1384_v35 = vpop.eup %1212 }
 0x12f   :  { %v134_v33 = vpop.xlane.xlu0 %133  ;;  %v140_v38 = vmul.f32 %v1384_v35, %v1380_v32  ;;  %v154_v59 = vmul.f32 %v1211_v34, %v153_v52  ;;  %vm146_vm4 = vweird.f32 %v1384_v35 }
 0x130   :  { %1214 = vrsqrt.f32 %v134_v33  ;;  %vm175_vm11 = vweird.f32 %v134_v33  ;;  %vm138_vm14 = vcmp.gt.f32.partialorder %v134_v33, 0.0 }
 0x131   :  { %v141_v43 = vmul.f32 %v1384_v35, %v140_v38  ;;  %v158_v5 = vsel %vm1396_vm3, %v1211_v34, %v154_v59  ;;  %v1136_v34 = vld [vmem:[%s1641_s3 + $0x28] sm:$0xff] }
 0x132   :  { %476 = vmatpush.msrb.mxu0 %v1136_v34 }
 0x133   :  { %v142_v49 = vmul.f32 0.5, %v141_v43  ;;  %v503_v43 = vld [vmem:[#allocation2] sm:$0xff] }
 0x135   :  { %v143_v56 = vsub.f32 1.5, %v142_v49 }
 0x136   :  { %v1215_v37 = vpop.eup %1214 }
 0x137   :  { %v170_v39 = vmul.f32 %v1215_v37, %v134_v33  ;;  %v131_v40 = vpop.xlane.xlu0 %130  ;;  %vm176_vm10 = vweird.f32 %v1215_v37  ;;  %v144_v62 = vmul.f32 %v1384_v35, %v143_v56 }
 0x138   :  { %1216 = vrsqrt.f32 %v131_v40  ;;  %vm177_vm12 = vmor %vm175_vm11, %vm176_vm10  ;;  %vm165_vm2 = vweird.f32 %v131_v40  ;;  %vm137_vm8 = vcmp.gt.f32.partialorder %v131_v40, 0.0  ;;  %vm287_vm10 = vcmask 130048  }
 0x139   :  { %v171_v42 = vmul.f32 %v1215_v37, %v170_v39  ;;  %vm186_vm11 = vcmp.eq.s32.totalorder %v1337_v4, %v184_v45  ;;  %1117 = vmatmul.msk.f32.vlgmr.msra.gmra.mxu3 %vm287_vm10, %v1415_v6 }
 0x13b   :  { %v172_v44 = vmul.f32 0.5, %v171_v42  ;;  %v504_v42 = vld [vmem:[#allocation2 + $0x8] sm:$0xff] }
 0x13d   :  { %v173_v47 = vsub.f32 1.5, %v172_v44  ;;  %v1529_v44 = vld [vmem:[%s1645_s7] sm:$0x3f] }
 0x13e   :  { %v1217_v48 = vpop.eup %1216  ;;  %v286_v46 = vperm.slane %v1529_v44, 0 }
 0x13f   :  { %v160_v50 = vmul.f32 %v1217_v48, %v131_v40  ;;  %v174_v51 = vmul.f32 %v1215_v37, %v173_v47  ;;  %vm166_vm0 = vweird.f32 %v1217_v48  ;;  %v506_v40 = vld [vmem:[#allocation2 + $0x18] sm:$0xff] }
 0x140   :  { %vm167_vm6 = vmor %vm165_vm2, %vm166_vm0 }
 0x141   :  { %v161_v53 = vmul.f32 %v1217_v48, %v160_v50  ;;  %v178_v54 = vsel %vm177_vm12, %v1215_v37, %v174_v51  ;;  %vm147_vm12 = vmor %vm145_vm5, %vm146_vm4 }
 0x142   :  { %v1392_v55 = vsel %vm138_vm14, %v178_v54, 0.0  ;;  %v148_v9 = vsel %vm147_vm12, %v1384_v35, %v144_v62  ;;  %vm185_vm14 = vcmp.eq.s32.totalorder %v1328_v1, %v184_v45  ;;  %v1441_v1 = vld [vmem:[%s1638_s0 + $0x8] sm:$0xff]  ;;  %v1135_v35 = vld [vmem:[%s1641_s3 + $0x20] sm:$0xff] }
 0x143   :  { %v162_v57 = vmul.f32 0.5, %v161_v53  ;;  %1105 = vmatpush.msk.msra.mxu1 %vm188_vm13, %v1392_v55  ;;  %vm136_vm13 = vcmp.gt.f32.partialorder %v1378_v31, 0.0  ;;  %v179_v4 = vsel %vm135_vm15, %v148_v9, 0.0  ;;  %343 = vmatpush.msrb.mxu3 %v1441_v1 }
 0x144   :  { %v180_v10 = vsel %vm136_vm13, %v158_v5, 0.0  ;;  %1118 = vmatmul.msk.f32.gmra.mxu3 %vm287_vm10, %v1441_v1  ;;  %477 = vmatpush.msrb.mxu0 %v1135_v35 }
 0x145   :  { %v163_v58 = vsub.f32 1.5, %v162_v57  ;;  %344 = vmatpush.msrb.mxu3 %v1415_v6 }
 0x147   :  { %v164_v60 = vmul.f32 %v1217_v48, %v163_v58  ;;  %532 = vmatpush.msra.mxu3 %v506_v40  ;;  %v718_v40 = vld [vmem:[#allocation4 + $0x18] sm:$0xff] }
 0x149   :  { %v168_v3 = vsel %vm167_vm6, %v1217_v48, %v164_v60  ;;  %533 = vmatpush.msra.mxu3 %v505_v41  ;;  %v717_v41 = vld [vmem:[#allocation4 + $0x10] sm:$0xff] }
 0x14a   :  { %v181_v2 = vsel %vm137_vm8, %v168_v3, 0.0  ;;  %vm1085_vm8 = vcmask 1040384  }
 0x14b   :  { %1106 = vmatpush.msk.msra.mxu1 %vm187_vm7, %v181_v2  ;;  %534 = vmatpush.msra.mxu3 %v504_v42 }
 0x14c   :  { %1119 = vmatmul.msk.f32.gmra.mxu3 %vm287_vm10, %v1433_v11 }
 0x14d   :  { %1107 = vmatpush.msk.msra.mxu1 %vm186_vm11, %v180_v10  ;;  %535 = vmatpush.msra.mxu3 %v503_v43  ;;  %v716_v43 = vld [vmem:[#allocation4 + $0x8] sm:$0xff] }
 0x14f   :  { %1108 = vmatpush.msk.msra.mxu1 %vm185_vm14, %v179_v4 }
 0x150   :  { %1109 = vmatmul.msk.f32.vlgmr.msra.gmra.mxu1 %vm122_vm9, %v1362_v23 }
 0x151   :  { %387 = vmatpush.msrb.mxu1 %v1126_v20  ;;  %v661_v20 = vld [vmem:[#allocation2 + $0x58] sm:$0xff] }
 0x153   :  { %388 = vmatpush.msrb.mxu1 %v1125_v22  ;;  %v660_v22 = vld [vmem:[#allocation2 + $0x50] sm:$0xff] }
 0x154   :  { %1120 = vmatmul.msk.f32.gmra.mxu3 %vm287_vm10, %v1421_v8 }
 0x158   :  { %1110 = vmatmul.msk.f32.gmra.mxu1 %vm122_vm9, %v1364_v24 }
 0x160   :  { %1111 = vmatmul.msk.f32.gmra.mxu1 %vm122_vm9, %v1368_v26 }
 0x168   :  { %1112 = vmatmul.msk.f32.gmra.mxu1 %vm122_vm9, %v1372_v28 }
 0x1bc   :  { %v317_v21 = vpop.f32.mrf.mxu3 }
 0x1bd   :  { %v318_v47 = vadd.f32 %v317_v21, %v286_v46  ;;  %v581_v21 = vld [vmem:[#allocation2 + $0x30] sm:$0xff] }
 0x1c7   :  { %v320_v23 = vpop.f32.mrf.mxu3 }
 0x1c8   :  { %v321_v52 = vadd.f32 %v320_v23, %v286_v46  ;;  %v580_v23 = vld [vmem:[#allocation2 + $0x28] sm:$0xff] }
 0x1cd   :  { %v222_v12 = vpop.f32.mrf.mxu1 }
 0x1ce   :  { %v1457_v13 = vmul.f32 %v222_v12, %v179_v4 }
 0x1cf   :  { %v323_v24 = vpop.f32.mrf.mxu3 }
 0x1d0   :  { %1121 = vmatmul.msk.f32.vlgmr.msrb.gmra.mxu3 %vm122_vm9, %v1457_v13  ;;  %v324_v59 = vadd.f32 %v323_v24, %v286_v46  ;;  %v659_v24 = vld [vmem:[#allocation2 + $0x48] sm:$0xff] }
 0x1d1   :  { %686 = vmatpush.msrb.mxu3 %v661_v20 }
 0x1d3   :  { %687 = vmatpush.msrb.mxu3 %v660_v22 }
 0x1d5   :  { %v225_v14 = vpop.f32.mrf.mxu1  ;;  %688 = vmatpush.msrb.mxu3 %v659_v24 }
 0x1d6   :  { %v1461_v15 = vmul.f32 %v225_v14, %v180_v10 }
 0x1d7   :  { %v326_v25 = vpop.f32.mrf.mxu3 }
 0x1d8   :  { %1122 = vmatmul.msk.f32.gmra.mxu3 %vm122_vm9, %v1461_v15  ;;  %v327_v3 = vadd.f32 %v326_v25, %v286_v46  ;;  %v579_v25 = vld [vmem:[#allocation2 + $0x20] sm:$0xff] }
 0x1dd   :  { %v228_v16 = vpop.f32.mrf.mxu1 }
 0x1de   :  { %v1465_v17 = vmul.f32 %v228_v16, %v181_v2 }
 0x1e0   :  { %1123 = vmatmul.msk.f32.gmra.mxu3 %vm122_vm9, %v1465_v17 }
 0x1e5   :  { %v231_v18 = vpop.f32.mrf.mxu1 }
 0x1e6   :  { %v1470_v19 = vmul.f32 %v231_v18, %v1392_v55  ;;  %v582_v18 = vld [vmem:[#allocation2 + $0x38] sm:$0xff] }
 0x1e8   :  { %262 = vmatpush.msra.mxu2 %v1470_v19  ;;  %1124 = vmatmul.msk.f32.gmra.mxu3 %vm122_vm9, %v1470_v19 }
 0x1ea   :  { %263 = vmatpush.msra.mxu2 %v1465_v17 }
 0x1ec   :  { %264 = vmatpush.msra.mxu2 %v1461_v15 }
 0x1ee   :  { %265 = vmatpush.msra.mxu2 %v1457_v13 }
 0x1ef   :  { %1113 = vmatmul.msk.f32.vlgmr.msra.gmra.mxu2 %vm122_vm9, %v1457_v13 }
 0x1f0   :  { %430 = vmatpush.msrb.mxu2 %v1421_v8 }
 0x1f2   :  { %431 = vmatpush.msrb.mxu2 %v1433_v11 }
 0x1f4   :  { %432 = vmatpush.msrb.mxu2 %v1441_v1 }
 0x1f6   :  { %433 = vmatpush.msrb.mxu2 %v1415_v6 }
 0x1f7   :  { %1114 = vmatmul.msk.f32.gmra.mxu2 %vm122_vm9, %v1461_v15 }
 0x1f8   :  { %607 = vmatpush.msra.mxu2 %v582_v18 }
 0x1fa   :  { %608 = vmatpush.msra.mxu2 %v581_v21 }
 0x1fc   :  { %609 = vmatpush.msra.mxu2 %v580_v23  ;;  %v871_v23 = vld [vmem:[#allocation4 + $0x48] sm:$0xff] }
 0x1fe   :  { %610 = vmatpush.msra.mxu2 %v579_v25  ;;  %v1275_v25 = vmov 0  }
 0x1ff   :  { %1115 = vmatmul.msk.f32.gmra.mxu2 %vm122_vm9, %v1465_v17  ;;  %1207 = vset.pattern.permute.xlu2 %v1275_v25 }
 0x200   :  { %1208 = vset.pattern.permute.xlu0 %v1275_v25  ;;  %1209 = vset.pattern.permute.xlu1 %v1275_v25 }
 0x207   :  { %1116 = vmatmul.msk.f32.gmra.mxu2 %vm122_vm9, %v1470_v19 }
 0x253   :  { %v346_v26 = vpop.f32.mrf.mxu3 }
 0x254   :  { %1127 = vmatmul.msk.f32.vlgmr.msrb.gmra.mxu1 %vm287_vm10, %v346_v26  ;;  %v658_v26 = vld [vmem:[#allocation2 + $0x40] sm:$0xff] }
 0x255   :  { %689 = vmatpush.msrb.mxu3 %v658_v26  ;;  %v968_v26 = vld [vmem:[%s1640_s2 + $0x8] sm:$0xff] }
 0x256   :  { %vm972_vm1 = vcmp.eq.s32.totalorder %v968_v26, 0  ;;  %vm1029_vm3 = vcmp.eq.s32.totalorder %v968_v26, 1 }
 0x25b   :  { %v349_v27 = vpop.f32.mrf.mxu3 }
 0x25c   :  { %1128 = vmatmul.msk.f32.gmra.mxu1 %vm287_vm10, %v349_v27 }
 0x263   :  { %v352_v28 = vpop.f32.mrf.mxu3 }
 0x264   :  { %1129 = vmatmul.msk.f32.gmra.mxu1 %vm287_vm10, %v352_v28 }
 0x26b   :  { %v355_v29 = vpop.f32.mrf.mxu3 }
 0x26c   :  { %1130 = vmatmul.msk.f32.gmra.mxu1 %vm287_vm10, %v355_v29 }
 0x272   :  { %v1500_v30 = vpop.f32.mrf.mxu2 }
 0x273   :  { %1131 = vmatmul.msk.f32.vlgmr.msrb.gmra.mxu2 %vm122_vm9, %v1500_v30 }
 0x27a   :  { %v1504_v31 = vpop.f32.mrf.mxu2 }
 0x27b   :  { %1132 = vmatmul.msk.f32.gmra.mxu2 %vm122_vm9, %v1504_v31 }
 0x282   :  { %v1508_v32 = vpop.f32.mrf.mxu2 }
 0x283   :  { %1133 = vmatmul.msk.f32.gmra.mxu2 %vm122_vm9, %v1508_v32 }
 0x28a   :  { %v1512_v33 = vpop.f32.mrf.mxu2 }
 0x28b   :  { %1134 = vmatmul.msk.f32.gmra.mxu2 %vm122_vm9, %v1512_v33 }
 0x2d1   :  { %v390_v45 = vpop.f32.mrf.mxu1 }
 0x2d2   :  { %v402_v48 = vadd.f32 %v390_v45, %v318_v47  ;;  %v715_v45 = vld [vmem:[#allocation4] sm:$0xff] }
 0x2d9   :  { %v393_v49 = vpop.f32.mrf.mxu1 }
 0x2da   :  { %v403_v55 = vadd.f32 %v393_v49, %v321_v52 }
 0x2e1   :  { %v396_v58 = vpop.f32.mrf.mxu1 }
 0x2e2   :  { %v404_v62 = vadd.f32 %v396_v58, %v324_v59 }
 0x2e9   :  { %v399_v2 = vpop.f32.mrf.mxu1 }
 0x2ea   :  { %v405_v10 = vadd.f32 %v399_v2, %v327_v3 }
 0x2f6   :  { %v435_v36 = vpop.f32.mrf.mxu2 }
 0x2f7   :  { %1137 = vmatmul.msk.f32.vlgmr.msrb.gmra.mxu0 %vm287_vm10, %v435_v36 }
 0x2fe   :  { %v438_v37 = vpop.f32.mrf.mxu2 }
 0x2ff   :  { %1138 = vmatmul.msk.f32.gmra.mxu0 %vm287_vm10, %v438_v37 }
 0x306   :  { %v441_v38 = vpop.f32.mrf.mxu2 }
 0x307   :  { %1139 = vmatmul.msk.f32.gmra.mxu0 %vm287_vm10, %v441_v38 }
 0x30e   :  { %v444_v39 = vpop.f32.mrf.mxu2 }
 0x30f   :  { %1140 = vmatmul.msk.f32.gmra.mxu0 %vm287_vm10, %v444_v39 }
 0x374   :  { %v479_v50 = vpop.f32.mrf.mxu0 }
 0x375   :  { %v491_v51 = vadd.f32 %v479_v50, %v402_v48  ;;  %v507_v48 = vperm.slane %v1529_v44, 1 }
 0x377   :  { %v495_v53 = vmul.f32 0.01, %v491_v51 }
 0x379   :  { %v499_v54 = vmax.f32 %v491_v51, %v495_v53 }
 0x37b   :  { %1141 = vmatmul.msk.f32.vlgmr.msra.gmra.mxu3 %vm122_vm9, %v499_v54 }
 0x37c   :  { %v482_v56 = vpop.f32.mrf.mxu0 }
 0x37d   :  { %v492_v57 = vadd.f32 %v482_v56, %v403_v55 }
 0x37f   :  { %v496_v60 = vmul.f32 0.01, %v492_v57 }
 0x381   :  { %v500_v61 = vmax.f32 %v492_v57, %v496_v60 }
 0x383   :  { %1142 = vmatmul.msk.f32.gmra.mxu3 %vm122_vm9, %v500_v61 }
 0x384   :  { %v485_v63 = vpop.f32.mrf.mxu0 }
 0x385   :  { %v493_v0 = vadd.f32 %v485_v63, %v404_v62 }
 0x387   :  { %v497_v5 = vmul.f32 0.01, %v493_v0 }
 0x389   :  { %v501_v9 = vmax.f32 %v493_v0, %v497_v5 }
 0x38b   :  { %1143 = vmatmul.msk.f32.gmra.mxu3 %vm122_vm9, %v501_v9 }
 0x38c   :  { %v488_v4 = vpop.f32.mrf.mxu0 }
 0x38d   :  { %v494_v12 = vadd.f32 %v488_v4, %v405_v10 }
 0x38f   :  { %v498_v14 = vmul.f32 0.01, %v494_v12 }
 0x391   :  { %v502_v16 = vmax.f32 %v494_v12, %v498_v14 }
 0x393   :  { %1144 = vmatmul.msk.f32.gmra.mxu3 %vm122_vm9, %v502_v16  ;;  %561 = vmatpush.msra.mxu1 %v502_v16 }
 0x394   :  { %640 = vmatpush.msra.mxu0 %v502_v16 }
 0x395   :  { %562 = vmatpush.msra.mxu1 %v501_v9 }
 0x396   :  { %641 = vmatpush.msra.mxu0 %v501_v9 }
 0x397   :  { %563 = vmatpush.msra.mxu1 %v500_v61 }
 0x398   :  { %642 = vmatpush.msra.mxu0 %v500_v61 }
 0x399   :  { %564 = vmatpush.msra.mxu1 %v499_v54 }
 0x39a   :  { %643 = vmatpush.msra.mxu0 %v499_v54  ;;  %1145 = vmatmul.msk.f32.vlgmr.msra.gmra.mxu1 %vm122_vm9, %v1457_v13 }
 0x39b   :  { %1153 = vmatmul.msk.f32.vlgmr.msra.gmra.mxu0 %vm122_vm9, %v1500_v30  ;;  %744 = vmatpush.msrb.mxu1 %v718_v40  ;;  %v1194_v40 = vsel %vm1029_vm3, 1.0, %v1274_v7 }
 0x39d   :  { %745 = vmatpush.msrb.mxu1 %v717_v41  ;;  %v1198_v41 = vadd.f32 -1.0, %v1194_v40  ;;  %v962_v40 = vperm.slane %v1529_v44, 3 }
 0x39f   :  { %746 = vmatpush.msrb.mxu1 %v716_v43  ;;  %v969_v43 = vld [vmem:[%s1640_s2 + $0x10] sm:$0xff] }
 0x3a0   :  { %vm1030_vm4 = vcmp.eq.s32.totalorder %v969_v43, 1  ;;  %vm973_vm5 = vcmp.eq.s32.totalorder %v969_v43, 0 }
 0x3a1   :  { %747 = vmatpush.msrb.mxu1 %v715_v45 }
 0x3a2   :  { %1146 = vmatmul.msk.f32.gmra.mxu1 %vm122_vm9, %v1461_v15 }
 0x3a3   :  { %1154 = vmatmul.msk.f32.gmra.mxu0 %vm122_vm9, %v1504_v31 }
 0x3aa   :  { %1147 = vmatmul.msk.f32.gmra.mxu1 %vm122_vm9, %v1465_v17 }
 0x3ab   :  { %1155 = vmatmul.msk.f32.gmra.mxu0 %vm122_vm9, %v1508_v32 }
 0x3b2   :  { %1148 = vmatmul.msk.f32.gmra.mxu1 %vm122_vm9, %v1470_v19 }
 0x3b3   :  { %1156 = vmatmul.msk.f32.gmra.mxu0 %vm122_vm9, %v1512_v33 }
 0x3fe   :  { %v537_v39 = vpop.f32.mrf.mxu3 }
 0x3ff   :  { %v538_v49 = vadd.f32 %v537_v39, %v507_v48 }
 0x406   :  { %v540_v42 = vpop.f32.mrf.mxu3 }
 0x407   :  { %v541_v55 = vadd.f32 %v540_v42, %v507_v48  ;;  %v1045_v42 = vmul.f32 1e+30, %v1198_v41 }
 0x40e   :  { %v543_v46 = vpop.f32.mrf.mxu3 }
 0x40f   :  { %v544_v62 = vadd.f32 %v543_v46, %v507_v48 }
 0x416   :  { %v546_v47 = vpop.f32.mrf.mxu3 }
 0x417   :  { %v566_v27 = vpop.f32.mrf.mxu1  ;;  %v547_v10 = vadd.f32 %v546_v47, %v507_v48  ;;  %v1187_v47 = vsel %vm973_vm5, 1.0, %v1274_v7 }
 0x418   :  { %v645_v28 = vpop.f32.mrf.mxu0  ;;  %1149 = vmatmul.msk.f32.vlgmr.msra.gmra.mxu2 %vm122_vm9, %v566_v27  ;;  %v1186_v27 = vsel %vm972_vm1, 1.0, %v1274_v7  ;;  %v1191_v48 = vadd.f32 -1.0, %v1187_v47 }
 0x419   :  { %1157 = vmatmul.msk.f32.vlgmr.msrb.gmra.mxu3 %vm122_vm9, %v645_v28  ;;  %v1190_v28 = vadd.f32 -1.0, %v1186_v27 }
 0x41f   :  { %v569_v29 = vpop.f32.mrf.mxu1 }
 0x420   :  { %v648_v34 = vpop.f32.mrf.mxu0  ;;  %1150 = vmatmul.msk.f32.gmra.mxu2 %vm122_vm9, %v569_v29  ;;  %v988_v29 = vmul.f32 1e+30, %v1190_v28 }
 0x421   :  { %1158 = vmatmul.msk.f32.gmra.mxu3 %vm122_vm9, %v648_v34  ;;  %v791_v34 = vld [vmem:[#allocation4 + $0x20] sm:$0xff] }
 0x427   :  { %v572_v35 = vpop.f32.mrf.mxu1 }
 0x428   :  { %v651_v36 = vpop.f32.mrf.mxu0  ;;  %1151 = vmatmul.msk.f32.gmra.mxu2 %vm122_vm9, %v572_v35  ;;  %v870_v35 = vld [vmem:[#allocation4 + $0x40] sm:$0xff] }
 0x429   :  { %1159 = vmatmul.msk.f32.gmra.mxu3 %vm122_vm9, %v651_v36  ;;  %v927_v36 = vld [vmem:[%s1644_s6] sm:$0xff] }
 0x42f   :  { %v575_v37 = vpop.f32.mrf.mxu1 }
 0x430   :  { %v654_v38 = vpop.f32.mrf.mxu0  ;;  %1152 = vmatmul.msk.f32.gmra.mxu2 %vm122_vm9, %v575_v37 }
 0x431   :  { %1160 = vmatmul.msk.f32.gmra.mxu3 %vm122_vm9, %v654_v38 }
 0x49b   :  { %v612_v50 = vpop.f32.mrf.mxu2 }
 0x49c   :  { %v624_v51 = vadd.f32 %v612_v50, %v538_v49  ;;  %v691_v52 = vpop.f32.mrf.mxu3 }
 0x49e   :  { %v703_v53 = vadd.f32 %v691_v52, %v624_v51  ;;  %v989_v52 = vmul.f32 1e+30, %v1191_v48 }
 0x4a0   :  { %v707_v54 = vmul.f32 0.01, %v703_v53  ;;  %1003 = vperm.xlu0 %1208, %v989_v52  }
 0x4a2   :  { %v711_v56 = vmax.f32 %v703_v53, %v707_v54 }
 0x4a3   :  { %v615_v57 = vpop.f32.mrf.mxu2 }
 0x4a4   :  { %v625_v58 = vadd.f32 %v615_v57, %v541_v55  ;;  %v694_v59 = vpop.f32.mrf.mxu3  ;;  %1161 = vmatmul.msk.f32.vlgmr.msrb.gmra.mxu1 %vm122_vm9, %v711_v56 }
 0x4a6   :  { %v704_v60 = vadd.f32 %v694_v59, %v625_v58 }
 0x4a8   :  { %v708_v61 = vmul.f32 0.01, %v704_v60 }
 0x4aa   :  { %v712_v63 = vmax.f32 %v704_v60, %v708_v61 }
 0x4ab   :  { %v618_v0 = vpop.f32.mrf.mxu2 }
 0x4ac   :  { %v626_v3 = vadd.f32 %v618_v0, %v544_v62  ;;  %v697_v5 = vpop.f32.mrf.mxu3  ;;  %1162 = vmatmul.msk.f32.gmra.mxu1 %vm122_vm9, %v712_v63 }
 0x4ae   :  { %v705_v2 = vadd.f32 %v697_v5, %v626_v3 }
 0x4b0   :  { %v709_v9 = vmul.f32 0.01, %v705_v2 }
 0x4b2   :  { %v713_v4 = vmax.f32 %v705_v2, %v709_v9 }
 0x4b3   :  { %v621_v12 = vpop.f32.mrf.mxu2 }
 0x4b4   :  { %v627_v14 = vadd.f32 %v621_v12, %v547_v10  ;;  %1163 = vmatmul.msk.f32.gmra.mxu1 %vm122_vm9, %v713_v4  ;;  %v700_v16 = vpop.f32.mrf.mxu3 }
 0x4b6   :  { %v706_v18 = vadd.f32 %v700_v16, %v627_v14 }
 0x4b8   :  { %v710_v20 = vmul.f32 0.01, %v706_v18 }
 0x4ba   :  { %v714_v21 = vmax.f32 %v706_v18, %v710_v20 }
 0x4bc   :  { %1164 = vmatmul.msk.f32.gmra.mxu1 %vm122_vm9, %v714_v21  ;;  %773 = vmatpush.msrb.mxu2 %v714_v21 }
 0x4bd   :  { %852 = vmatpush.msra.mxu3 %v714_v21 }
 0x4be   :  { %774 = vmatpush.msrb.mxu2 %v713_v4 }
 0x4bf   :  { %853 = vmatpush.msra.mxu3 %v713_v4  ;;  %v719_v4 = vperm.slane %v1529_v44, 2 }
 0x4c0   :  { %775 = vmatpush.msrb.mxu2 %v712_v63 }
 0x4c1   :  { %854 = vmatpush.msra.mxu3 %v712_v63 }
 0x4c2   :  { %776 = vmatpush.msrb.mxu2 %v711_v56 }
 0x4c3   :  { %855 = vmatpush.msra.mxu3 %v711_v56  ;;  %1165 = vmatmul.msk.f32.vlgmr.msrb.gmra.mxu2 %vm122_vm9, %v1457_v13  ;;  %v967_v13 = vld [vmem:[%s1640_s2] sm:$0xff] }
 0x4c4   :  { %1173 = vmatmul.msk.f32.vlgmr.msra.gmra.mxu3 %vm122_vm9, %v1500_v30  ;;  %vm971_vm0 = vcmp.eq.s32.totalorder %v967_v13, 0  ;;  %v873_v30 = vld [vmem:[#allocation4 + $0x58] sm:$0xff]  ;;  %vm1028_vm2 = vcmp.eq.s32.totalorder %v967_v13, 1 }
 0x4c5   :  { %v1185_v22 = vsel %vm971_vm0, 1.0, %v1274_v7  ;;  %898 = vmatpush.msra.mxu1 %v873_v30  ;;  %v1193_v37 = vsel %vm1028_vm2, 1.0, %v1274_v7 }
 0x4c6   :  { %v1197_v38 = vadd.f32 -1.0, %v1193_v37 }
 0x4c8   :  { %v1044_v39 = vmul.f32 1e+30, %v1197_v38 }
 0x4cb   :  { %1166 = vmatmul.msk.f32.gmra.mxu2 %vm122_vm9, %v1461_v15  ;;  %v794_v15 = vld [vmem:[#allocation4 + $0x38] sm:$0xff] }
 0x4cc   :  { %1174 = vmatmul.msk.f32.gmra.mxu3 %vm122_vm9, %v1504_v31  ;;  %v793_v31 = vld [vmem:[#allocation4 + $0x30] sm:$0xff]  ;;  %819 = vmatpush.msrb.mxu0 %v794_v15 }
 0x4ce   :  { %820 = vmatpush.msrb.mxu0 %v793_v31 }
 0x4d3   :  { %1167 = vmatmul.msk.f32.gmra.mxu2 %vm122_vm9, %v1465_v17  ;;  %v872_v17 = vld [vmem:[#allocation4 + $0x50] sm:$0xff] }
 0x4d4   :  { %1175 = vmatmul.msk.f32.gmra.mxu3 %vm122_vm9, %v1508_v32  ;;  %v1189_v32 = vadd.f32 -1.0, %v1185_v22  ;;  %899 = vmatpush.msra.mxu1 %v872_v17 }
 0x4d6   :  { %v987_v24 = vmul.f32 1e+30, %v1189_v32  ;;  %900 = vmatpush.msra.mxu1 %v871_v23 }
 0x4d8   :  { %993 = vperm.xlu2 %1207, %v987_v24   ;;  %901 = vmatpush.msra.mxu1 %v870_v35 }
 0x4db   :  { %1168 = vmatmul.msk.f32.gmra.mxu2 %vm122_vm9, %v1470_v19  ;;  %v928_v19 = vld [vmem:[%s1644_s6 + $0x8] sm:$0xff] }
 0x4dc   :  { %1176 = vmatmul.msk.f32.gmra.mxu3 %vm122_vm9, %v1512_v33  ;;  %943 = vmatpush.msra.mxu2 %v928_v19  ;;  %v792_v33 = vld [vmem:[#allocation4 + $0x28] sm:$0xff] }
 0x4dd   :  { %821 = vmatpush.msrb.mxu0 %v792_v33 }
 0x4de   :  { %944 = vmatpush.msra.mxu2 %v927_v36 }
 0x4df   :  { %822 = vmatpush.msrb.mxu0 %v791_v34 }
 0x4e0   :  { %998 = vperm.xlu2 %1207, %v988_v29  }
 0x4e3   :  { %1181 = vmatmul.msk.f32.vlgmr.msra.gmra.mxu2 %vm287_vm10, %v1415_v6  ;;  %v1195_v6 = vsel %vm1030_vm4, 1.0, %v1274_v7 }
 0x4e4   :  { %v1199_v45 = vadd.f32 -1.0, %v1195_v6 }
 0x4e6   :  { %v1046_v46 = vmul.f32 1e+30, %v1199_v45 }
 0x4e8   :  { %1050 = vperm.xlu2 %1207, %v1044_v39  }
 0x4eb   :  { %1182 = vmatmul.msk.f32.gmra.mxu2 %vm287_vm10, %v1441_v1  ;;  %v970_v1 = vld [vmem:[%s1640_s2 + $0x18] sm:$0xff] }
 0x4ec   :  { %vm974_vm6 = vcmp.eq.s32.totalorder %v970_v1, 0  ;;  %vm1031_vm7 = vcmp.eq.s32.totalorder %v970_v1, 1 }
 0x4ed   :  { %v1196_v49 = vsel %vm1031_vm7, 1.0, %v1274_v7 }
 0x4ee   :  { %v1200_v51 = vadd.f32 -1.0, %v1196_v49 }
 0x4f0   :  { %1055 = vperm.xlu2 %1207, %v1045_v42   ;;  %v1047_v54 = vmul.f32 1e+30, %v1200_v51 }
 0x4f3   :  { %1183 = vmatmul.msk.f32.gmra.mxu2 %vm287_vm10, %v1433_v11  ;;  %v1188_v11 = vsel %vm974_vm6, 1.0, %v1274_v7 }
 0x4f4   :  { %v1192_v50 = vadd.f32 -1.0, %v1188_v11 }
 0x4f6   :  { %v990_v53 = vmul.f32 1e+30, %v1192_v50 }
 0x4f8   :  { %1060 = vperm.xlu2 %1207, %v1046_v46   ;;  %1008 = vperm.xlu1 %1209, %v990_v53  }
 0x4fb   :  { %1184 = vmatmul.msk.f32.gmra.mxu2 %vm287_vm10, %v1421_v8  ;;  %vm1095_vm10 = vcmask 1024  }
 0x500   :  { %1065 = vperm.xlu2 %1207, %v1047_v54  }
 0x512   :  { %v1004_v49 = vpop.permute.xlu0 %1003 }
 0x521   :  { %v749_v61 = vpop.f32.mrf.mxu1 }
 0x522   :  { %v750_v16 = vadd.f32 %v749_v61, %v719_v4 }
 0x529   :  { %v752_v62 = vpop.f32.mrf.mxu1 }
 0x52a   :  { %v753_v14 = vadd.f32 %v752_v62, %v719_v4 }
 0x531   :  { %v755_v63 = vpop.f32.mrf.mxu1 }
 0x532   :  { %v994_v0 = vpop.permute.xlu2 %993  ;;  %v756_v22 = vadd.f32 %v755_v63, %v719_v4 }
 0x539   :  { %v758_v3 = vpop.f32.mrf.mxu1 }
 0x53a   :  { %v999_v5 = vpop.permute.xlu2 %998  ;;  %v759_v34 = vadd.f32 %v758_v3, %v719_v4 }
 0x542   :  { %v1051_v12 = vpop.permute.xlu2 %1050 }
 0x546   :  { %v778_v55 = vpop.f32.mrf.mxu2 }
 0x547   :  { %v857_v56 = vpop.f32.mrf.mxu3  ;;  %1169 = vmatmul.msk.f32.vlgmr.msrb.gmra.mxu0 %vm122_vm9, %v778_v55 }
 0x548   :  { %1177 = vmatmul.msk.f32.vlgmr.msra.gmra.mxu1 %vm122_vm9, %v857_v56 }
 0x54a   :  { %v1056_v17 = vpop.permute.xlu2 %1055 }
 0x54e   :  { %v781_v8 = vpop.f32.mrf.mxu2 }
 0x54f   :  { %v860_v57 = vpop.f32.mrf.mxu3  ;;  %1170 = vmatmul.msk.f32.gmra.mxu0 %vm122_vm9, %v781_v8 }
 0x550   :  { %1178 = vmatmul.msk.f32.gmra.mxu1 %vm122_vm9, %v860_v57 }
 0x552   :  { %v1061_v41 = vpop.permute.xlu2 %1060 }
 0x556   :  { %v784_v7 = vpop.f32.mrf.mxu2 }
 0x557   :  { %v863_v58 = vpop.f32.mrf.mxu3  ;;  %1171 = vmatmul.msk.f32.gmra.mxu0 %vm122_vm9, %v784_v7 }
 0x558   :  { %1179 = vmatmul.msk.f32.gmra.mxu1 %vm122_vm9, %v863_v58 }
 0x55a   :  { %v1066_v7 = vpop.permute.xlu2 %1065 }
 0x55e   :  { %v787_v59 = vpop.f32.mrf.mxu2 }
 0x55f   :  { %v866_v60 = vpop.f32.mrf.mxu3  ;;  %1172 = vmatmul.msk.f32.gmra.mxu0 %vm122_vm9, %v787_v59 }
 0x560   :  { %1180 = vmatmul.msk.f32.gmra.mxu1 %vm122_vm9, %v866_v60 }
 0x566   :  { %v946_v9 = vpop.f32.mrf.mxu2 }
 0x56a   :  { %v1009_v55 = vpop.permute.xlu1 %1008 }
 0x56e   :  { %v949_v15 = vpop.f32.mrf.mxu2 }
 0x576   :  { %v952_v26 = vpop.f32.mrf.mxu2 }
 0x57e   :  { %v955_v47 = vpop.f32.mrf.mxu2 }
 0x5c4   :  { %v824_v2 = vpop.f32.mrf.mxu0 }
 0x5c5   :  { %v903_v10 = vpop.f32.mrf.mxu1  ;;  %v836_v13 = vadd.f32 %v824_v2, %v750_v16 }
 0x5c7   :  { %v915_v31 = vadd.f32 %v903_v10, %v836_v13 }
 0x5c9   :  { %v919_v24 = vmul.f32 0.01, %v915_v31 }
 0x5cb   :  { %v923_v29 = vmax.f32 %v915_v31, %v919_v24 }
 0x5cc   :  { %v827_v18 = vpop.f32.mrf.mxu0 }
 0x5cd   :  { %v837_v20 = vadd.f32 %v827_v18, %v753_v14  ;;  %v906_v21 = vpop.f32.mrf.mxu1  ;;  %v958_v39 = vadd.f32 %v946_v9, %v923_v29 }
 0x5cf   :  { %v916_v30 = vadd.f32 %v906_v21, %v837_v20  ;;  %v963_v1 = vadd.f32 %v962_v40, %v958_v39 }
 0x5d1   :  { %v920_v32 = vmul.f32 0.01, %v916_v30  ;;  %v1011_v53 = vadd.f32 %v994_v0, %v963_v1  ;;  %v1068_v54 = vadd.f32 %v1051_v12, %v963_v1 }
 0x5d3   :  { %v924_v28 = vmax.f32 %v916_v30, %v920_v32  ;;  %v1015_v62 = vsel %vm122_vm9, %v1011_v53, -inf  ;;  %v1072_v63 = vsel %vm122_vm9, %v1068_v54, -inf  ;;  %v1087_v32 = vperm.slane %v1529_v44, 4 }
 0x5d4   :  { %v830_v19 = vpop.f32.mrf.mxu0 }
 0x5d5   :  { %v838_v33 = vadd.f32 %v830_v19, %v756_v22  ;;  %v909_v23 = vpop.f32.mrf.mxu1  ;;  %v959_v37 = vadd.f32 %v949_v15, %v924_v28 }
 0x5d7   :  { %v917_v25 = vadd.f32 %v909_v23, %v838_v33  ;;  %v964_v45 = vadd.f32 %v962_v40, %v959_v37 }
 0x5d9   :  { %v921_v27 = vmul.f32 0.01, %v917_v25  ;;  %v1012_v50 = vadd.f32 %v999_v5, %v964_v45  ;;  %v1069_v51 = vadd.f32 %v1056_v17, %v964_v45 }
 0x5db   :  { %v925_v35 = vmax.f32 %v917_v25, %v921_v27  ;;  %v1016_v58 = vsel %vm122_vm9, %v1012_v50, -inf  ;;  %v1073_v59 = vsel %vm122_vm9, %v1069_v51, -inf  ;;  %v1093_v27 = vperm.slane %v1529_v44, 5 }
 0x5dc   :  { %v833_v36 = vpop.f32.mrf.mxu0  ;;  %v1076_v9 = vmax.f32 %v1072_v63, %v1073_v59  ;;  %v1019_v10 = vmax.f32 %v1015_v62, %v1016_v58 }
 0x5dd   :  { %v839_v38 = vadd.f32 %v833_v36, %v759_v34  ;;  %v912_v42 = vpop.f32.mrf.mxu1  ;;  %v960_v6 = vadd.f32 %v952_v26, %v925_v35 }
 0x5df   :  { %v918_v43 = vadd.f32 %v912_v42, %v839_v38  ;;  %v965_v48 = vadd.f32 %v962_v40, %v960_v6 }
 0x5e1   :  { %v922_v46 = vmul.f32 0.01, %v918_v43  ;;  %v1070_v56 = vadd.f32 %v1061_v41, %v965_v48  ;;  %v1013_v8 = vadd.f32 %v1004_v49, %v965_v48 }
 0x5e3   :  { %v926_v11 = vmax.f32 %v918_v43, %v922_v46  ;;  %v1074_v3 = vsel %vm122_vm9, %v1070_v56, -inf  ;;  %v1017_v0 = vsel %vm122_vm9, %v1013_v8, -inf }
 0x5e5   :  { %v961_v52 = vadd.f32 %v955_v47, %v926_v11 }
 0x5e7   :  { %v966_v57 = vadd.f32 %v962_v40, %v961_v52 }
 0x5e9   :  { %v1014_v60 = vadd.f32 %v1009_v55, %v966_v57  ;;  %v1071_v61 = vadd.f32 %v1066_v7, %v966_v57 }
 0x5eb   :  { %v1018_v5 = vsel %vm122_vm9, %v1014_v60, -inf  ;;  %v1075_v2 = vsel %vm122_vm9, %v1071_v61, -inf  ;;  %vm1089_vm9 = vcmask 254976  }
 0x5ec   :  { %v1020_v4 = vmax.f32 %v1017_v0, %v1018_v5  ;;  %v1077_v12 = vmax.f32 %v1074_v3, %v1075_v2 }
 0x5ee   :  { %v1021_v14 = vmax.f32 %v1019_v10, %v1020_v4  ;;  %v1078_v16 = vmax.f32 %v1076_v9, %v1077_v12 }
 0x5f0   :  { %v1022_v18 = vrot.slane %v1021_v14, 4  ;;  %v1079_v20 = vrot.slane %v1078_v16, 4 }
 0x5f2   :  { %v1023_v21 = vmax.f32 %v1021_v14, %v1022_v18  ;;  %v1080_v13 = vmax.f32 %v1078_v16, %v1079_v20 }
 0x5f4   :  { %v1024_v15 = vrot.slane %v1023_v21, 2  ;;  %v1081_v30 = vrot.slane %v1080_v13, 2 }
 0x5f6   :  { %v1025_v31 = vmax.f32 %v1023_v21, %v1024_v15  ;;  %v1082_v22 = vmax.f32 %v1080_v13, %v1081_v30 }
 0x5f8   :  { %v1026_v17 = vrot.slane %v1025_v31, 1  ;;  %v1083_v19 = vrot.slane %v1082_v22, 1 }
 0x5fa   :  { %v1027_v33 = vmax.f32 %v1025_v31, %v1026_v17  ;;  %v1084_v23 = vmax.f32 %v1082_v22, %v1083_v19 }
 0x5fc   :  { %v1086_v24 = vsel %vm1085_vm8, %v1027_v33, %v1084_v23 }
 0x5fd   :  { %v1088_v25 = vmul.f32 %v1087_v32, %v1086_v24 }
 0x5ff   :  { %v1090_v26 = vsel %vm1089_vm9, %v1088_v25, 0.0 }
 0x600   :  { %1091 = vadd.xlane.f32.xlu1 %v1090_v26 }
 0x673   :  { %v1092_v28 = vpop.xlane.xlu1 %1091 }
 0x674   :  { %v1094_v29 = vadd.f32 %v1093_v27, %v1092_v28 }
 0x676   :  { %1096 = vst.msk [vmem:[%s1646_s8] sm:$0x3] %vm1095_vm10, %v1094_v29 }
 0x677   :  { %1101 = vsyncpa [#allocation3], 1 }
 0x678   :  { %1102 = vsyncpa [#allocation5], 1 }

</bundles_post_ra>
